<compile_context>
chip_gen: v5e
topology: v5e:2x2
jax: 0.10.0
libtpu: 0.0.40
codegen_flags: <defaults>
</compile_context>

<pallas_src>
import jax
import jax.numpy as jnp
from jax.experimental import pallas as pl
from jax.experimental.pallas import tpu as pltpu

_LANE = 128


def _round_up(x, m):
    return (x + m - 1) // m * m


def _cdiv(a, b):
    return (a + b - 1) // b


def _layer_kind(li, din, dout, n_linear, small_k):
    if li == n_linear - 1 and dout == 1:
        return "reduce"      # final out=1 layer: multiply + sublane reduce
    if din <= small_k:
        return "fma"         # degenerate contraction: broadcast FMAs on VPU
    return "mxu"             # real matmul on the MXU


def _make_mlp_kernel(layer_dims, chunk, n_chunks, hidden_dtype, small_k):
    """Fused MLP kernel.

    Ref order: x_ref, w0, b0, w1, b1, ..., o_ref
      x_ref : (n_chunks, d_in, chunk)   chunk index leading, batch on lanes
      o_ref : (n_chunks, d_out, chunk)
      w_i   : (out_i, in_i) PyTorch layout; final out==1 layer pre-transposed (in, 1)
      b_i   : (out_i, 1)
    """
    n_linear = len(layer_dims)
    kinds = [_layer_kind(li, d[0], d[1], n_linear, small_k)
             for li, d in enumerate(layer_dims)]

    def kernel(x_ref, *refs):
        o_ref = refs[-1]
        wb = refs[:-1]

        # Load the (tiny) parameters once per grid step and hoist every
        # loop-invariant lane-broadcast out of the chunk loop.
        params = []
        for li, (din, dout) in enumerate(layer_dims):
            w = wb[2 * li][...]
            b = wb[2 * li + 1][...].astype(jnp.float32)            # (dout, 1)
            kind = kinds[li]
            if kind == "reduce":
                params.append((w.astype(jnp.float32), b))          # (din,1),(1,1)
            elif kind == "fma":
                cols = tuple(
                    jnp.broadcast_to(w[:, k:k + 1].astype(jnp.float32),
                                     (dout, chunk))
                    for k in range(din))
                bb = jnp.broadcast_to(b, (dout, chunk))
                params.append((cols, bb))
            else:  # "mxu" -- weight kept in its (possibly bf16) dtype
                bb = jnp.broadcast_to(b, (dout, chunk))
                params.append((w, bb))

        # Inner lane-chunk loop: bounds live ranges so the per-layer chain
        # stays register-resident instead of spilling full-tile temporaries.
        @pl.loop(0, n_chunks)
        def _(c):
            a = x_ref[c].astype(jnp.float32)                       # (d_in, chunk)
            for li, (din, dout) in enumerate(layer_dims):
                kind = kinds[li]
                is_last = li == n_linear - 1
                if kind == "reduce":
                    w_col, b_sc = params[li]
                    z = jnp.sum(w_col * a.astype(jnp.float32), axis=0,
                                keepdims=True) + b_sc              # (1, chunk)
                elif kind == "fma":
                    cols, bb = params[li]
                    z = bb
                    for k in range(din):                            # static unroll
                        z = z + cols[k] * a[k:k + 1, :].astype(jnp.float32)
                else:  # "mxu": MXU matmul with f32 accumulation
                    w, bb = params[li]
                    z = jnp.dot(w, a.astype(w.dtype),
                                preferred_element_type=jnp.float32) + bb
                a = z if is_last else jnp.tanh(z.astype(hidden_dtype))
            o_ref[c] = a.astype(o_ref.dtype)

    return kernel


def mlp_forward(x, weights, biases, *, tile_n=8192, chunk_n=256,
                hidden_dtype=jnp.float32, small_k=8):
    """Fused MLP forward pass.

    Args:
      x:        (N, layers[0]) float32.
      weights:  list of (out_i, in_i) float32 arrays (PyTorch nn.Linear layout).
      biases:   list of (out_i,) float32 arrays.
      tile_n:   target batch lanes per grid step (amortizes ~0.35 us/step).
      chunk_n:  lanes per register-resident inner chunk (multiple of 128).
      hidden_dtype: dtype of hidden activations / MXU inputs.  jnp.bfloat16
                roughly doubles tanh (EUP) and MXU throughput on v6e/v7x at
                ~1e-3 activation error; keep float32 on v5e or for strict
                accuracy.
    """
    n, d_in = x.shape
    n_linear = len(weights)
    layer_dims = [(int(w.shape[1]), int(w.shape[0])) for w in weights]
    d_out = layer_dims[-1][1]
    assert layer_dims[0][0] == d_in
    kinds = [_layer_kind(li, d[0], d[1], n_linear, small_k)
             for li, d in enumerate(layer_dims)]

    # ---- batch tiling -----------------------------------------------------
    # chunk: inner register-friendly slab.  tile = chunks_per_tile * chunk per
    # grid step.  Grid rounded up to an even count when there are >= 2 chunks
    # so both v7x TensorCores are fed by the "parallel" axis.
    chunk = min(_round_up(max(chunk_n, _LANE), _LANE), _round_up(n, _LANE))
    total_chunks = _cdiv(n, chunk)
    cpt_target = max(_round_up(max(tile_n, chunk), chunk) // chunk, 1)
    grid = _cdiv(total_chunks, cpt_target)
    if grid % 2 == 1 and total_chunks >= 2:
        grid += 1
    cpt = _cdiv(total_chunks, grid)
    n_slabs = grid * cpt
    n_pad = n_slabs * chunk

    # Batch-on-lanes, chunk-major input layout: (n_slabs, d_in, chunk).
    # TODO(synk): if the data pipeline can hand x over in this layout already,
    # the pad/transpose pass below can be dropped (kernel is compute-bound, so
    # this is only a small wrapper cost).
    x_pad = jnp.zeros((n_pad, d_in), x.dtype).at[:n, :].set(x)
    x3 = x_pad.reshape(n_slabs, chunk, d_in).transpose(0, 2, 1)

    # Kernel parameter operands.
    ops = []
    for li, (w, b) in enumerate(zip(weights, biases)):
        w = jnp.asarray(w)
        if kinds[li] == "reduce":
            ops.append(w.astype(jnp.float32).reshape(1, -1).T)    # (in, 1)
        elif kinds[li] == "mxu":
            ops.append(w.astype(hidden_dtype))                    # bf16-able
        else:
            ops.append(w.astype(jnp.float32))
        ops.append(jnp.asarray(b, jnp.float32).reshape(-1, 1))    # (out, 1)

    in_specs = [pl.BlockSpec((cpt, d_in, chunk), lambda i: (i, 0, 0))]
    for op in ops:
        # Whole-array blocks, constant block index: parameters stay resident
        # in VMEM across the whole grid (a few KiB total).
        in_specs.append(pl.BlockSpec(op.shape, lambda i: (0, 0)))
    out_spec = pl.BlockSpec((cpt, d_out, chunk), lambda i: (i, 0, 0))

    flops = 2 * n_pad * sum(di * do for di, do in layer_dims)
    transcendentals = n_pad * sum(do for _, do in layer_dims[:-1])
    bytes_accessed = 4 * (int(x3.size) + n_pad * d_out) + sum(
        int(o.size) * o.dtype.itemsize for o in ops)

    out3 = pl.pallas_call(
        _make_mlp_kernel(layer_dims, chunk, cpt, hidden_dtype, small_k),
        out_shape=jax.ShapeDtypeStruct((n_slabs, d_out, chunk), x.dtype),
        grid_spec=pl.GridSpec(grid=(grid,), in_specs=in_specs,
                              out_specs=out_spec),
        compiler_params=pltpu.CompilerParams(
            dimension_semantics=("parallel",)),
        cost_estimate=pl.CostEstimate(
            flops=flops, transcendentals=transcendentals,
            bytes_accessed=bytes_accessed),
    )(x3, *ops)

    return out3.transpose(0, 2, 1).reshape(n_pad, d_out)[:n]


def mlp_reference(x, weights, biases):
    a = x
    for i, (w, b) in enumerate(zip(weights, biases)):
        z = a @ w.T + b
        a = jnp.tanh(z) if i < len(weights) - 1 else z
    return a


if __name__ == "__main__":
    # Module config (mirrors P(w, b, layers)): small MLP, final output dim = 1.
    layers = [2, 32, 32, 1]

    key = jax.random.PRNGKey(0)
    keys = jax.random.split(key, 2 * (len(layers) - 1) + 1)

    # Deterministic synthetic parameters in PyTorch nn.Linear layout (out, in).
    weights, biases = [], []
    for i in range(len(layers) - 1):
        fan_in, fan_out = layers[i], layers[i + 1]
        w = 0.1 * jax.random.normal(keys[2 * i], (fan_out, fan_in), dtype=jnp.float32)
        b = 0.1 * jax.random.normal(keys[2 * i + 1], (fan_out,), dtype=jnp.float32)
        weights.append(w)
        biases.append(b)

    # float32 path: near-exact vs reference.  Cases cover a single 128-lane
    # chunk, a ragged batch (lane padding), a grid split to 2 tiles (feeds both
    # v7x TensorCores), a multi-chunk inner loop, and small explicit tiles.
    for batch, kw in (
        (128, {}),
        (200, {}),
        (640, {}),
        (2048, {"tile_n": 8192, "chunk_n": 256}),
        (512, {"tile_n": 256, "chunk_n": 128}),
    ):
        x = jax.random.normal(keys[-1], (batch, layers[0]), dtype=jnp.float32)
        out = jax.block_until_ready(mlp_forward(x, weights, biases, **kw))
        ref = mlp_reference(x, weights, biases)
        assert out.shape == (batch, 1), out.shape
        err = float(jnp.max(jnp.abs(out - ref)))
        assert err < 1e-5, (batch, err)

    # bf16 hidden-activation / bf16-MXU path (v6e/v7x speedup); looser tolerance.
    x = jax.random.normal(keys[-1], (2048, layers[0]), dtype=jnp.float32)
    out = jax.block_until_ready(
        mlp_forward(x, weights, biases, hidden_dtype=jnp.bfloat16))
    ref = mlp_reference(x, weights, biases)
    err = float(jnp.max(jnp.abs(out - ref)))
    assert err < 2e-2, err

    print("KERNEL_OK")
</pallas_src>

<mosaic_0001>
module attributes {stable_mosaic.version = 11 : i64} {
  func.func @kernel(%arg0: i32, %arg1: memref<1x2x128xf32, #tpu.memory_space<vmem>>, %arg2: memref<32x2xf32, #tpu.memory_space<vmem>>, %arg3: memref<32x1xf32, #tpu.memory_space<vmem>>, %arg4: memref<32x32xf32, #tpu.memory_space<vmem>>, %arg5: memref<32x1xf32, #tpu.memory_space<vmem>>, %arg6: memref<32x1xf32, #tpu.memory_space<vmem>>, %arg7: memref<1x1xf32, #tpu.memory_space<vmem>>, %arg8: memref<1x1x128xf32, #tpu.memory_space<vmem>>) attributes {dimension_semantics = [#tpu.dimension_semantics<parallel>], iteration_bounds = array<i64: 1>, scalar_prefetch = 0 : i64, scratch_operands = 0 : i64, tpu.core_type = #tpu.core_type<tc>, window_params = [{transform_indices = @transform_0, window_bounds = array<i64: 1, 2, 128>}, {pipeline_mode = #tpu.pipeline_mode<synchronous>, transform_indices = @transform_1, window_bounds = array<i64: 32, 2>}, {pipeline_mode = #tpu.pipeline_mode<synchronous>, transform_indices = @transform_2, window_bounds = array<i64: 32, 1>}, {pipeline_mode = #tpu.pipeline_mode<synchronous>, transform_indices = @transform_3, window_bounds = array<i64: 32, 32>}, {pipeline_mode = #tpu.pipeline_mode<synchronous>, transform_indices = @transform_4, window_bounds = array<i64: 32, 1>}, {pipeline_mode = #tpu.pipeline_mode<synchronous>, transform_indices = @transform_5, window_bounds = array<i64: 32, 1>}, {pipeline_mode = #tpu.pipeline_mode<synchronous>, transform_indices = @transform_6, window_bounds = array<i64: 1, 1>}, {transform_indices = @transform_7, window_bounds = array<i64: 1, 1, 128>}]} {
    %c0 = arith.constant 0 : index
    %c0_0 = arith.constant 0 : index
    %0 = vector.load %arg2[%c0, %c0_0] : memref<32x2xf32, #tpu.memory_space<vmem>>, vector<32x2xf32>
    %c0_1 = arith.constant 0 : index
    %c0_2 = arith.constant 0 : index
    %1 = vector.load %arg3[%c0_1, %c0_2] : memref<32x1xf32, #tpu.memory_space<vmem>>, vector<32x1xf32>
    %2 = vector.extract_strided_slice %0 {offsets = [0, 0], sizes = [32, 1], strides = [1, 1]} : vector<32x2xf32> to vector<32x1xf32>
    %3 = vector.shape_cast %2 : vector<32x1xf32> to vector<32x1xf32>
    %4 = vector.broadcast %3 : vector<32x1xf32> to vector<32x128xf32>
    %5 = vector.extract_strided_slice %0 {offsets = [0, 1], sizes = [32, 1], strides = [1, 1]} : vector<32x2xf32> to vector<32x1xf32>
    %6 = vector.shape_cast %5 : vector<32x1xf32> to vector<32x1xf32>
    %7 = vector.broadcast %6 : vector<32x1xf32> to vector<32x128xf32>
    %8 = vector.shape_cast %1 : vector<32x1xf32> to vector<32x1xf32>
    %9 = vector.broadcast %8 : vector<32x1xf32> to vector<32x128xf32>
    %c0_3 = arith.constant 0 : index
    %c0_4 = arith.constant 0 : index
    %10 = vector.load %arg4[%c0_3, %c0_4] : memref<32x32xf32, #tpu.memory_space<vmem>>, vector<32x32xf32>
    %c0_5 = arith.constant 0 : index
    %c0_6 = arith.constant 0 : index
    %11 = vector.load %arg5[%c0_5, %c0_6] : memref<32x1xf32, #tpu.memory_space<vmem>>, vector<32x1xf32>
    %12 = vector.shape_cast %11 : vector<32x1xf32> to vector<32x1xf32>
    %13 = vector.broadcast %12 : vector<32x1xf32> to vector<32x128xf32>
    %c0_7 = arith.constant 0 : index
    %c0_8 = arith.constant 0 : index
    %14 = vector.load %arg6[%c0_7, %c0_8] : memref<32x1xf32, #tpu.memory_space<vmem>>, vector<32x1xf32>
    %c0_9 = arith.constant 0 : index
    %c0_10 = arith.constant 0 : index
    %15 = vector.load %arg7[%c0_9, %c0_10] : memref<1x1xf32, #tpu.memory_space<vmem>>, vector<1x1xf32>
    %c0_i32 = arith.constant 0 : i32
    %c1_i32 = arith.constant 1 : i32
    %16 = arith.muli %c0_i32, %c1_i32 : i32
    %c0_i32_11 = arith.constant 0 : i32
    %17 = arith.addi %c0_i32_11, %16 : i32
    %18 = arith.index_cast %17 : i32 to index
    %c0_12 = arith.constant 0 : index
    %c0_13 = arith.constant 0 : index
    %19 = vector.load %arg1[%18, %c0_12, %c0_13] : memref<1x2x128xf32, #tpu.memory_space<vmem>>, vector<1x2x128xf32>
    %20 = vector.shape_cast %19 : vector<1x2x128xf32> to vector<2x128xf32>
    %21 = vector.extract_strided_slice %20 {offsets = [0, 0], sizes = [1, 128], strides = [1, 1]} : vector<2x128xf32> to vector<1x128xf32>
    %22 = vector.broadcast %21 : vector<1x128xf32> to vector<32x128xf32>
    %23 = arith.mulf %4, %22 : vector<32x128xf32>
    %24 = arith.addf %9, %23 : vector<32x128xf32>
    %25 = vector.extract_strided_slice %20 {offsets = [1, 0], sizes = [1, 128], strides = [1, 1]} : vector<2x128xf32> to vector<1x128xf32>
    %26 = vector.broadcast %25 : vector<1x128xf32> to vector<32x128xf32>
    %27 = arith.mulf %7, %26 : vector<32x128xf32>
    %28 = arith.addf %24, %27 : vector<32x128xf32>
    %29 = math.tanh %28 : vector<32x128xf32>
    %cst = arith.constant dense<0.000000e+00> : vector<32x128xf32>
    %30 = tpu.matmul %10, %29, %cst {dimension_numbers = #tpu.dot_dimension_numbers<[1], [0], [0], [1], [0, 0, 1, 1], [], []>} : vector<32x32xf32>, vector<32x128xf32>, vector<32x128xf32> -> vector<32x128xf32>
    %31 = arith.addf %30, %13 : vector<32x128xf32>
    %32 = math.tanh %31 : vector<32x128xf32>
    %33 = vector.broadcast %14 : vector<32x1xf32> to vector<32x128xf32>
    %34 = arith.mulf %33, %32 : vector<32x128xf32>
    %cst_14 = arith.constant dense<0.000000e+00> : vector<128xf32>
    %35 = vector.multi_reduction <add>, %34, %cst_14 [0] : vector<32x128xf32> to vector<128xf32>
    %36 = vector.shape_cast %35 : vector<128xf32> to vector<1x128xf32>
    %37 = vector.broadcast %15 : vector<1x1xf32> to vector<1x128xf32>
    %38 = arith.addf %36, %37 : vector<1x128xf32>
    %39 = arith.index_cast %17 : i32 to index
    %c0_15 = arith.constant 0 : index
    %c0_16 = arith.constant 0 : index
    %40 = vector.load %arg8[%39, %c0_15, %c0_16] : memref<1x1x128xf32, #tpu.memory_space<vmem>>, vector<1x1x128xf32>
    %41 = vector.shape_cast %40 : vector<1x1x128xf32> to vector<1x128xf32>
    %42 = vector.shape_cast %38 : vector<1x128xf32> to vector<1x1x128xf32>
    tpu.vector_store %arg8[%39, %c0_15, %c0_16], %42 {strides = array<i32>} : memref<1x1x128xf32, #tpu.memory_space<vmem>>, vector<1x1x128xf32>,
    %c1_i32_17 = arith.constant 1 : i32
    return
  }
  func.func @transform_0(%arg0: i32) -> (i32, i32, i32) {
    %c0_i32 = arith.constant 0 : i32
    %c0_i32_0 = arith.constant 0 : i32
    %c0_i32_1 = arith.constant 0 : i32
    return %arg0, %c0_i32, %c0_i32_0 : i32, i32, i32
  }
  func.func @transform_1(%arg0: i32) -> (i32, i32) {
    %c0_i32 = arith.constant 0 : i32
    %c0_i32_0 = arith.constant 0 : i32
    %c0_i32_1 = arith.constant 0 : i32
    return %c0_i32, %c0_i32_0 : i32, i32
  }
  func.func @transform_2(%arg0: i32) -> (i32, i32) {
    %c0_i32 = arith.constant 0 : i32
    %c0_i32_0 = arith.constant 0 : i32
    %c0_i32_1 = arith.constant 0 : i32
    return %c0_i32, %c0_i32_0 : i32, i32
  }
  func.func @transform_3(%arg0: i32) -> (i32, i32) {
    %c0_i32 = arith.constant 0 : i32
    %c0_i32_0 = arith.constant 0 : i32
    %c0_i32_1 = arith.constant 0 : i32
    return %c0_i32, %c0_i32_0 : i32, i32
  }
  func.func @transform_4(%arg0: i32) -> (i32, i32) {
    %c0_i32 = arith.constant 0 : i32
    %c0_i32_0 = arith.constant 0 : i32
    %c0_i32_1 = arith.constant 0 : i32
    return %c0_i32, %c0_i32_0 : i32, i32
  }
  func.func @transform_5(%arg0: i32) -> (i32, i32) {
    %c0_i32 = arith.constant 0 : i32
    %c0_i32_0 = arith.constant 0 : i32
    %c0_i32_1 = arith.constant 0 : i32
    return %c0_i32, %c0_i32_0 : i32, i32
  }
  func.func @transform_6(%arg0: i32) -> (i32, i32) {
    %c0_i32 = arith.constant 0 : i32
    %c0_i32_0 = arith.constant 0 : i32
    %c0_i32_1 = arith.constant 0 : i32
    return %c0_i32, %c0_i32_0 : i32, i32
  }
  func.func @transform_7(%arg0: i32) -> (i32, i32, i32) {
    %c0_i32 = arith.constant 0 : i32
    %c0_i32_0 = arith.constant 0 : i32
    %c0_i32_1 = arith.constant 0 : i32
    return %arg0, %c0_i32, %c0_i32_0 : i32, i32, i32
  }
}

</mosaic_0001>

<bundles_post_ra>
// kernel: tpu_custom_call.1
= control target key start
LH: loop header
LB: loop body
LE: loop exit
PB: predicated region body
PF: predicated region fallthrough
CT: control target
= control target key end

     0   :  { %s433_s0 = inlined_call_operand.vmem [shape: f32[1,2,128], index: 0, kind: input, shape index: {}]   ;;  %s434_s1 = inlined_call_operand.vmem [shape: f32[32,2], index: 1, kind: input, shape index: {}]   ;;  %s435_s2 = inlined_call_operand.vmem [shape: f32[32,1], index: 2, kind: input, shape index: {}]   ;;  %s436_s3 = inlined_call_operand.vmem [shape: f32[32,32], index: 3, kind: input, shape index: {}]   ;;  %s437_s4 = inlined_call_operand.vmem [shape: f32[32,1], index: 4, kind: input, shape index: {}]   ;;  %s438_s5 = inlined_call_operand.vmem [shape: f32[32,1], index: 5, kind: input, shape index: {}]   ;;  %s439_s6 = inlined_call_operand.<no memory space> [shape: f32[1,1], index: 6, kind: input, shape index: {}]   ;;  %s440_s7 = inlined_call_operand.hbm [shape: f32[1,1,128], index: 7, kind: output, shape index: {}]  }
   0x1   :  { %v12_v0 = vstv %s439_s6 }
   0x2   :  { %13 = vst [vmem:[#allocation2] sm:$0x1] %v12_v0 }
   0x3   :  { %v32_v1 = vld [vmem:[%s434_s1 + $0x18] sm:$0xff]  ;;  %v30_v2 = vld [vmem:[%s434_s1 + $0x8] sm:$0xff]  ;;  %v321_v3 = vmov 1   ;;  %v322_v4 = vmov 0  }
   0x4   :  { %272 = vset.pattern.permute.xlu1 %v321_v3  ;;  %274 = vset.pattern.permute.xlu2 %v322_v4 }
   0x5   :  { %271 = vset.pattern.permute.xlu0 %v322_v4  ;;  %70 = vperm.xlu1 %272, %v32_v1  }
   0x6   :  { %54 = vperm.xlu0 %271, %v32_v1   ;;  %44 = vperm.xlu2 %274, %v30_v2  }
   0x7   :  { %14 = vsyncpa [#allocation4], 0  ;;  %v31_v5 = vld [vmem:[%s434_s1 + $0x10] sm:$0xff]  ;;  %v36_v6 = vld [vmem:[%s435_s2 + $0x18] sm:$0xff]  ;;  %vm149_vm0 = vcmask 261120   ;;  %s243_s18 = sshll.u32 %s440_s7, 4  ;;  %s244_s18 = int_to_ptr.hbm [resolvable:$true] %s243_s18 }
   0x8   :  { %v35_v7 = vld [vmem:[%s435_s2 + $0x10] sm:$0xff]  ;;  %v29_v8 = vld [vmem:[%s434_s1] sm:$0xff]  ;;  %v34_v9 = vld [vmem:[%s435_s2 + $0x8] sm:$0xff] }
   0x9   :  { %v33_v10 = vld [vmem:[%s435_s2] sm:$0xff]  ;;  %v99_v12 = vld [vmem:[%s437_s4 + $0x10] sm:$0xff]  ;;  %v100_v13 = vld [vmem:[%s437_s4 + $0x18] sm:$0xff] }
   0xa   :  { %v97_v11 = vld [vmem:[%s437_s4] sm:$0xff]  ;;  %v122_v14 = vld [vmem:[%s438_s5 + $0x8] sm:$0xff]  ;;  %v123_v15 = vld [vmem:[%s438_s5 + $0x10] sm:$0xff] }
   0xb   :  { %v125_v16 = vld [vmem:[#allocation2] sm:$0x1]  ;;  %v98_v20 = vld [vmem:[%s437_s4 + $0x8] sm:$0xff]  ;;  %v124_v35 = vld [vmem:[%s438_s5 + $0x18] sm:$0xff] }
   0xc   :  { %v126_v21 = vld [vmem:[%s433_s0] sm:$0x3]  ;;  %v94_v56 = vld [vmem:[%s436_s3 + $0x8] sm:$0xff]  ;;  %v95_v57 = vld [vmem:[%s436_s3 + $0x10] sm:$0xff] }
   0xd   :  { %273 = vset.pattern.permute.xlu1 %v322_v4  ;;  %v127_v22 = vperm.slane %v126_v21, 0  ;;  %v136_v23 = vperm.slane %v126_v21, 1  ;;  %v121_v28 = vld [vmem:[%s438_s5] sm:$0xff]  ;;  %v96_v58 = vld [vmem:[%s436_s3 + $0x18] sm:$0xff] }
   0xe   :  { %49 = vperm.xlu0 %271, %v31_v5   ;;  %275 = vset.pattern.permute.xlu2 %v321_v3  ;;  %v93_v55 = vld [vmem:[%s436_s3] sm:$0xff]  ;;  %s323_s3 = smov [#allocation3]  }
   0xf   :  { %90 = vperm.xlu1 %273, %v36_v6   ;;  %66 = vperm.xlu2 %275, %v31_v5   ;;  %s241_s15 = sshll.u32 %s323_s3, 4  ;;  %s242_s15 = int_to_ptr.vmem [resolvable:$true] %s241_s15 }
  0x16   :  { %85 = vperm.xlu0 %271, %v35_v7  }
  0x17   :  { %62 = vperm.xlu2 %275, %v30_v2   ;;  %39 = vperm.xlu1 %273, %v29_v8  }
  0x1e   :  { %80 = vperm.xlu0 %271, %v34_v9  }
  0x1f   :  { %277 = vset.pattern.permute.xlu2 %v322_v4  ;;  %276 = vset.pattern.permute.xlu1 %v321_v3 }
  0x20   :  { %75 = vperm.xlu2 %277, %v33_v10   ;;  %58 = vperm.xlu1 %276, %v29_v8  }
  0x26   :  { %103 = vperm.xlu0 %271, %v97_v11  }
  0x28   :  { %113 = vperm.xlu2 %277, %v99_v12   ;;  %278 = vset.pattern.permute.xlu1 %v322_v4 }
  0x29   :  { %108 = vperm.xlu1 %278, %v98_v20  }
  0x2e   :  { %118 = vperm.xlu0 %271, %v100_v13  }
  0x30   :  { %202 = vperm.xlu2 %277, %v122_v14  }
  0x31   :  { %197 = vperm.xlu1 %278, %v121_v28  }
  0x36   :  { %207 = vperm.xlu0 %271, %v123_v15  }
  0x38   :  { %230 = vperm.xlu2 %277, %v125_v16  }
  0x39   :  { %212 = vperm.xlu1 %278, %v124_v35  }
  0x60   :  { %v45_v17 = vpop.permute.xlu2 %44 }
  0x61   :  { %v129_v41 = vmul.f32 %v127_v22, %v45_v17 }
  0x69   :  { %v67_v24 = vpop.permute.xlu2 %66 }
  0x6a   :  { %v139_v36 = vmul.f32 %v136_v23, %v67_v24 }
  0x71   :  { %v63_v33 = vpop.permute.xlu2 %62 }
  0x72   :  { %v138_v44 = vmul.f32 %v136_v23, %v63_v33 }
  0x77   :  { %v71_v18 = vpop.permute.xlu1 %70 }
  0x78   :  { %v55_v19 = vpop.permute.xlu0 %54  ;;  %v140_v29 = vmul.f32 %v136_v23, %v71_v18 }
  0x79   :  { %v131_v25 = vmul.f32 %v127_v22, %v55_v19 }
  0x7a   :  { %v76_v46 = vpop.permute.xlu2 %75 }
  0x80   :  { %v50_v26 = vpop.permute.xlu0 %49 }
  0x81   :  { %v91_v27 = vpop.permute.xlu1 %90  ;;  %v130_v32 = vmul.f32 %v127_v22, %v50_v26 }
  0x82   :  { %v135_v30 = vadd.f32 %v131_v25, %v91_v27  ;;  %v114_v1 = vpop.permute.xlu2 %113 }
  0x84   :  { %v144_v31 = vadd.f32 %v140_v29, %v135_v30 }
  0x86   :  { %279 = vtanh.f32 %v144_v31 }
  0x88   :  { %v86_v34 = vpop.permute.xlu0 %85 }
  0x89   :  { %v134_v37 = vadd.f32 %v130_v32, %v86_v34  ;;  %v40_v38 = vpop.permute.xlu1 %39 }
  0x8a   :  { %v128_v42 = vmul.f32 %v127_v22, %v40_v38  ;;  %v203_v10 = vpop.permute.xlu2 %202 }
  0x8b   :  { %v143_v39 = vadd.f32 %v139_v36, %v134_v37 }
  0x8c   :  { %v280_v40 = vpop.eup %279  ;;  %v132_v49 = vadd.f32 %v128_v42, %v76_v46 }
  0x8d   :  { %281 = vtanh.f32 %v143_v39  ;;  %174 = vmatpush.msra.mxu0 %v280_v40  ;;  %256 = vmatpush.msra.mxu1 %v280_v40 }
  0x8e   :  { %257 = vmatpush.msra.mxu2 %v280_v40  ;;  %258 = vmatpush.msra.mxu3 %v280_v40 }
  0x90   :  { %v81_v43 = vpop.permute.xlu0 %80 }
  0x91   :  { %v133_v45 = vadd.f32 %v129_v41, %v81_v43 }
  0x92   :  { %v59_v47 = vpop.permute.xlu1 %58  ;;  %v231_v26 = vpop.permute.xlu2 %230 }
  0x93   :  { %v282_v48 = vpop.eup %281  ;;  %v142_v50 = vadd.f32 %v138_v44, %v133_v45  ;;  %v137_v51 = vmul.f32 %v136_v23, %v59_v47  ;;  %v233_v28 = vperm.slane %v231_v26, 0 }
  0x94   :  { %175 = vmatpush.msra.mxu0 %v282_v48  ;;  %259 = vmatpush.msra.mxu1 %v282_v48 }
  0x95   :  { %283 = vtanh.f32 %v142_v50  ;;  %v141_v52 = vadd.f32 %v137_v51, %v132_v49  ;;  %260 = vmatpush.msra.mxu2 %v282_v48  ;;  %261 = vmatpush.msra.mxu3 %v282_v48 }
  0x97   :  { %285 = vtanh.f32 %v141_v52 }
  0x98   :  { %v104_v59 = vpop.permute.xlu0 %103 }
  0x9b   :  { %v284_v53 = vpop.eup %283  ;;  %v109_v60 = vpop.permute.xlu1 %108 }
  0x9c   :  { %176 = vmatpush.msra.mxu0 %v284_v53  ;;  %262 = vmatpush.msra.mxu1 %v284_v53 }
  0x9d   :  { %v286_v54 = vpop.eup %285  ;;  %263 = vmatpush.msra.mxu2 %v284_v53  ;;  %264 = vmatpush.msra.mxu3 %v284_v53 }
  0x9e   :  { %177 = vmatpush.msra.mxu0 %v286_v54  ;;  %265 = vmatpush.msra.mxu1 %v286_v54 }
  0x9f   :  { %266 = vmatpush.msra.mxu2 %v286_v54  ;;  %267 = vmatpush.msra.mxu3 %v286_v54 }
  0xa0   :  { %252 = vmatmul.msk.f32.vlgmr.msra.gmra.mxu0 %vm149_vm0, %v93_v55  ;;  %253 = vmatmul.msk.f32.vlgmr.msra.gmra.mxu1 %vm149_vm0, %v94_v56  ;;  %v119_v2 = vpop.permute.xlu0 %118 }
  0xa1   :  { %254 = vmatmul.msk.f32.vlgmr.msra.gmra.mxu2 %vm149_vm0, %v95_v57  ;;  %255 = vmatmul.msk.f32.vlgmr.msra.gmra.mxu3 %vm149_vm0, %v96_v58 }
  0xa3   :  { %v198_v5 = vpop.permute.xlu1 %197 }
  0xa8   :  { %v208_v14 = vpop.permute.xlu0 %207 }
  0xab   :  { %v213_v18 = vpop.permute.xlu1 %212 }
 0x11d   :  { %v179_v61 = vpop.f32.mrf.mxu0  ;;  %v182_v62 = vpop.f32.mrf.mxu1 }
 0x11e   :  { %v180_v63 = vadd.f32 %v179_v61, %v104_v59  ;;  %v183_v0 = vadd.f32 %v182_v62, %v109_v60 }
 0x120   :  { %287 = vtanh.f32 %v180_v63 }
 0x121   :  { %289 = vtanh.f32 %v183_v0 }
 0x124   :  { %v185_v3 = vpop.f32.mrf.mxu2  ;;  %v188_v4 = vpop.f32.mrf.mxu3 }
 0x125   :  { %v186_v6 = vadd.f32 %v185_v3, %v114_v1  ;;  %v189_v7 = vadd.f32 %v188_v4, %v119_v2 }
 0x126   :  { %v288_v8 = vpop.eup %287 }
 0x127   :  { %v290_v9 = vpop.eup %289  ;;  %291 = vtanh.f32 %v186_v6  ;;  %v215_v11 = vmul.f32 %v288_v8, %v198_v5 }
 0x128   :  { %293 = vtanh.f32 %v189_v7  ;;  %v216_v12 = vmul.f32 %v290_v9, %v203_v10 }
 0x12a   :  { %v219_v16 = vadd.f32 %v216_v12, %v215_v11 }
 0x12d   :  { %v292_v13 = vpop.eup %291 }
 0x12e   :  { %v294_v15 = vpop.eup %293  ;;  %v217_v17 = vmul.f32 %v292_v13, %v208_v14 }
 0x12f   :  { %v218_v20 = vmul.f32 %v294_v15, %v213_v18 }
 0x130   :  { %v220_v19 = vadd.f32 %v219_v16, %v217_v17 }
 0x132   :  { %v221_v21 = vadd.f32 %v220_v19, %v218_v20 }
 0x134   :  { %v222_v22 = vrot.slane %v221_v21, 4 }
 0x136   :  { %v223_v23 = vadd.f32 %v222_v22, %v221_v21 }
 0x138   :  { %v224_v24 = vrot.slane %v223_v23, 2 }
 0x13a   :  { %v225_v25 = vadd.f32 %v224_v24, %v223_v23 }
 0x13c   :  { %v226_v27 = vrot.slane %v225_v25, 1 }
 0x13e   :  { %v227_v29 = vadd.f32 %v226_v27, %v225_v25 }
 0x140   :  { %v234_v30 = vadd.f32 %v233_v28, %v227_v29 }
 0x142   :  { %235 = vst [vmem:[#allocation3] sm:$0x1] %v234_v30 }
 0x143   :  { %246 = dma.vmem_to_hbm [thread:$0]  %s242_s15, 16, %s244_s18, [#allocation4]  }
 0x144   :  { %319 = dma.done.wait [#allocation4], 16  }
 0x145   :  { %320 = vsyncadd [#allocation4], 4294967280 }
 0x146   :  { %251 = vsyncpa [#allocation4], 1 }

</bundles_post_ra>
